<compile_context>
chip_gen: v5e
topology: v5e:2x2
jax: 0.10.0
libtpu: 0.0.40
codegen_flags: <defaults>
</compile_context>

<pallas_src>
import functools

import jax
import jax.numpy as jnp
import numpy as np
from jax.experimental import pallas as pl
from jax.experimental.pallas import tpu as pltpu


def _round8(n):
    return ((n + 7) // 8) * 8


# -----------------------------------------------------------------------------
# Kernel: fused embedding+input projection, pokemon bias, full LSTM recurrence
# -----------------------------------------------------------------------------
def encoder_kernel(idx_ref,   # (T*B, 1) int32   flattened sentence indices
                   pok_ref,   # (B, P)   f32     raw pokemon feature vector
                   w_ref,     # (Wrows, 4H) f32  packed pre-folded weights
                   out_ref,   # (2, B, H) f32    [hn ; cn]
                   *, T, B, V, H, P, off_whh, off_b, off_we):
    # ---- hoisted prologue (runs once, off the recurrent critical path) ------
    W_x = w_ref[0:V, :]                          # (V, 4H)  emb_table @ W_ih[:E]
    w_hh = w_ref[off_whh:off_whh + H, :]         # (H, 4H)
    b_eff = w_ref[off_b:off_b + 1, :]            # (1, 4H)
    W_eff = w_ref[off_we:off_we + P, :]          # (P, 4H)  w_pok @ W_ih[E:]

    # time-invariant pokemon contribution: ONE dot
    static_bias = (jnp.dot(pok_ref[...], W_eff,
                           preferred_element_type=jnp.float32)
                   + b_eff)                      # (B, 4H)

    # Embedding lookup fused with the input projection:
    #   one_hot(sentence) @ (emb_table @ W_ih_char)
    # computes every x_t @ W_ih in a single MXU op, so no input-side matmul
    # remains on the serial h -> h dependency chain.
    idx = idx_ref[...]                                               # (T*B, 1)
    iota = jax.lax.broadcasted_iota(jnp.int32, (T * B, V), 1)
    one_hot = (iota == idx).astype(jnp.float32)                      # (T*B, V)
    gx = jnp.dot(one_hot, W_x, preferred_element_type=jnp.float32)   # (T*B, 4H)

    h = jnp.zeros((B, H), jnp.float32)
    c = jnp.zeros((B, H), jnp.float32)

    # ---- fully unrolled recurrence: per step only h @ W_hh + elementwise ----
    # TODO(synk): for large T switch to lax.fori_loop(..., unroll=k) to bound
    # code size / vreg live ranges; T=8 static unroll is best here.
    for t in range(T):
        gates = (gx[t * B:(t + 1) * B, :] + static_bias
                 + jnp.dot(h, w_hh, preferred_element_type=jnp.float32))  # (B,4H)

        # full-vreg EUP activations; extract gate blocks afterwards.
        # Gate column order is [i, f, o, g].
        sg = jax.nn.sigmoid(gates)
        tg = jnp.tanh(gates)
        i_g = sg[:, 0:H]
        f_g = sg[:, H:2 * H]
        o_g = sg[:, 2 * H:3 * H]
        g_g = tg[:, 3 * H:4 * H]

        c = f_g * c + i_g * g_g
        h = o_g * jnp.tanh(c)

    out_ref[0] = h
    out_ref[1] = c


# -----------------------------------------------------------------------------
# One-time parameter preparation (offline; NOT in the per-call jitted path)
# -----------------------------------------------------------------------------
def prepare_params(params):
    """Gate reorder + weight folds + packing into a single VMEM array.
    Done in float64 on host so the folds don't change numerics."""
    emb = np.asarray(params["emb_table"], np.float64)    # (V, E)
    w_pok = np.asarray(params["w_pok"], np.float64)      # (P, PD)
    b_pok = np.asarray(params["b_pok"], np.float64)      # (1, PD)
    w_ih = np.asarray(params["w_ih"], np.float64)        # (E+PD, 4H) order [i,f,g,o]
    w_hh = np.asarray(params["w_hh"], np.float64)        # (H, 4H)    order [i,f,g,o]
    b = np.asarray(params["b"], np.float64)              # (1, 4H)    b_ih + b_hh

    V, E = emb.shape
    P = w_pok.shape[0]
    H = w_hh.shape[0]

    def reorder(w):  # [i, f, g, o] -> [i, f, o, g]
        return np.concatenate(
            [w[..., 0:2 * H], w[..., 3 * H:4 * H], w[..., 2 * H:3 * H]], axis=-1)

    w_ih_r = reorder(w_ih)
    w_hh_r = reorder(w_hh)
    b_r = reorder(b)
    w_ih_e = w_ih_r[:E]                      # char part
    w_ih_p = w_ih_r[E:]                      # pokemon part

    W_x = emb @ w_ih_e                       # (V, 4H)
    W_eff = w_pok @ w_ih_p                   # (P, 4H)
    b_eff = b_r + b_pok @ w_ih_p             # (1, 4H)

    off_whh = _round8(V)
    off_b = off_whh + _round8(H)
    off_we = off_b + 8
    total = _round8(off_we + P)

    packed = np.zeros((total, 4 * H), np.float32)
    packed[0:V] = W_x
    packed[off_whh:off_whh + H] = w_hh_r
    packed[off_b:off_b + 1] = b_eff
    packed[off_we:off_we + P] = W_eff

    return dict(packed=jnp.asarray(packed), V=V, H=H, P=P, E=E,
                off_whh=off_whh, off_b=off_b, off_we=off_we)


# -----------------------------------------------------------------------------
# Forward wrapper
# -----------------------------------------------------------------------------
def make_encoder_forward(prep):
    packed = prep["packed"]
    V, H, P = prep["V"], prep["H"], prep["P"]
    off_whh, off_b, off_we = prep["off_whh"], prep["off_b"], prep["off_we"]

    @jax.jit
    def forward(sentence, embedding):
        """
        sentence : int32 (T, B)   character indices
        embedding: f32   (B, P)   pokemon feature vector
        returns (hn, cn), each (1, B, H)
        """
        T, B = sentence.shape
        idx2d = sentence.reshape(T * B, 1).astype(jnp.int32)

        kern = functools.partial(
            encoder_kernel, T=T, B=B, V=V, H=H, P=P,
            off_whh=off_whh, off_b=off_b, off_we=off_we)

        out = pl.pallas_call(
            kern,
            out_shape=jax.ShapeDtypeStruct((2, B, H), jnp.float32),
            in_specs=[
                pl.BlockSpec(memory_space=pltpu.MemorySpace.VMEM),
                pl.BlockSpec(memory_space=pltpu.MemorySpace.VMEM),
                pl.BlockSpec(memory_space=pltpu.MemorySpace.VMEM),
            ],
            out_specs=pl.BlockSpec(memory_space=pltpu.MemorySpace.VMEM),
        )(idx2d, embedding, packed)

        return out[0:1], out[1:2]

    return forward


# -----------------------------------------------------------------------------
# Pure-JAX reference (uses the original, unreordered / unfolded weights)
# -----------------------------------------------------------------------------
def encoder_reference(sentence, embedding, params):
    embeds = jnp.take(params["emb_table"], sentence, axis=0)    # (T, B, E)
    pe = embedding @ params["w_pok"] + params["b_pok"]          # (B, PD)
    T, B = sentence.shape
    x = jnp.concatenate(
        [embeds, jnp.broadcast_to(pe, (T,) + pe.shape)], axis=-1)
    H = params["w_hh"].shape[0]

    def step(carry, x_t):
        h, c = carry
        gates = x_t @ params["w_ih"] + h @ params["w_hh"] + params["b"]
        i_g = jax.nn.sigmoid(gates[:, 0 * H:1 * H])
        f_g = jax.nn.sigmoid(gates[:, 1 * H:2 * H])
        g_g = jnp.tanh(gates[:, 2 * H:3 * H])
        o_g = jax.nn.sigmoid(gates[:, 3 * H:4 * H])
        c_new = f_g * c + i_g * g_g
        h_new = o_g * jnp.tanh(c_new)
        return (h_new, c_new), None

    (h, c), _ = jax.lax.scan(step, (jnp.zeros((B, H)), jnp.zeros((B, H))), x)
    return h[None], c[None]


# -----------------------------------------------------------------------------
# Main
# -----------------------------------------------------------------------------
if __name__ == "__main__":
    # Small synthetic cfg (consistent with the module's shapes):
    VOCABSIZE = 32       # cfg.CHAR.VOCABSIZE
    CHARVEC_DIM = 16     # cfg.CHARVEC.DIMENSION
    POKEMON_SIZE = 12    # cfg.POKEMON.SIZE
    POKEMON_DIM = 8      # cfg.POKEMON.DIMENSION
    HID_DIM = 32         # cfg.CHARLSTM.DIMENSION
    T, B = 8, 2          # sequence length, batch

    key = jax.random.PRNGKey(0)
    ks = jax.random.split(key, 8)

    # PyTorch weights are (out,in); stored pre-transposed as (in,out);
    # gate order is PyTorch [i,f,g,o]; prepare_params reorders/folds offline.
    params = {
        "emb_table": jax.random.normal(ks[0], (VOCABSIZE, CHARVEC_DIM), jnp.float32) * 0.1,
        "w_pok": jax.random.normal(ks[1], (POKEMON_SIZE, POKEMON_DIM), jnp.float32) * 0.1,
        "b_pok": jax.random.normal(ks[2], (1, POKEMON_DIM), jnp.float32) * 0.1,
        "w_ih": jax.random.normal(ks[3], (CHARVEC_DIM + POKEMON_DIM, 4 * HID_DIM), jnp.float32) * 0.1,
        "w_hh": jax.random.normal(ks[4], (HID_DIM, 4 * HID_DIM), jnp.float32) * 0.1,
        # combined bias b_ih + b_hh
        "b": jax.random.normal(ks[5], (1, 4 * HID_DIM), jnp.float32) * 0.1,
    }

    sentence = jax.random.randint(ks[6], (T, B), 0, VOCABSIZE, dtype=jnp.int32)
    embedding = jax.random.normal(ks[7], (B, POKEMON_SIZE), jnp.float32)

    prep = prepare_params(params)              # one-time, offline
    encoder_forward = make_encoder_forward(prep)

    hn, cn = encoder_forward(sentence, embedding)
    jax.block_until_ready((hn, cn))

    hn_ref, cn_ref = encoder_reference(sentence, embedding, params)
    np.testing.assert_allclose(np.asarray(hn), np.asarray(hn_ref), rtol=2e-5, atol=2e-5)
    np.testing.assert_allclose(np.asarray(cn), np.asarray(cn_ref), rtol=2e-5, atol=2e-5)

    print("KERNEL_OK")
</pallas_src>

<mosaic_0001>
module attributes {stable_mosaic.version = 11 : i64} {
  func.func @encoder_kernel(%arg0: memref<16x1xi32, #tpu.memory_space<vmem>>, %arg1: memref<2x12xf32, #tpu.memory_space<vmem>>, %arg2: memref<88x128xf32, #tpu.memory_space<vmem>>, %arg3: memref<2x2x32xf32, #tpu.memory_space<vmem>>) attributes {dimension_semantics = [], scalar_prefetch = 0 : i64, scratch_operands = 0 : i64, tpu.core_type = #tpu.core_type<tc>} {
    %c0 = arith.constant 0 : index
    %c0_0 = arith.constant 0 : index
    %0 = vector.load %arg2[%c0, %c0_0] : memref<88x128xf32, #tpu.memory_space<vmem>>, vector<32x128xf32>
    %c32 = arith.constant 32 : index
    %c0_1 = arith.constant 0 : index
    %1 = vector.load %arg2[%c32, %c0_1] : memref<88x128xf32, #tpu.memory_space<vmem>>, vector<32x128xf32>
    %c64 = arith.constant 64 : index
    %c0_2 = arith.constant 0 : index
    %2 = vector.load %arg2[%c64, %c0_2] : memref<88x128xf32, #tpu.memory_space<vmem>>, vector<1x128xf32>
    %c72 = arith.constant 72 : index
    %c0_3 = arith.constant 0 : index
    %3 = vector.load %arg2[%c72, %c0_3] : memref<88x128xf32, #tpu.memory_space<vmem>>, vector<12x128xf32>
    %c0_4 = arith.constant 0 : index
    %c0_5 = arith.constant 0 : index
    %4 = vector.load %arg1[%c0_4, %c0_5] : memref<2x12xf32, #tpu.memory_space<vmem>>, vector<2x12xf32>
    %cst = arith.constant dense<0.000000e+00> : vector<2x128xf32>
    %5 = tpu.matmul %4, %3, %cst {dimension_numbers = #tpu.dot_dimension_numbers<[1], [0], [0], [1], [0, 0, 1, 1], [], []>} : vector<2x12xf32>, vector<12x128xf32>, vector<2x128xf32> -> vector<2x128xf32>
    %6 = vector.broadcast %2 : vector<1x128xf32> to vector<2x128xf32>
    %7 = arith.addf %5, %6 : vector<2x128xf32>
    %c0_6 = arith.constant 0 : index
    %c0_7 = arith.constant 0 : index
    %8 = vector.load %arg0[%c0_6, %c0_7] : memref<16x1xi32, #tpu.memory_space<vmem>>, vector<16x1xi32>
    %9 = tpu.iota {dimensions = array<i32: 1>} : vector<16x32xi32>
    %10 = vector.broadcast %8 : vector<16x1xi32> to vector<16x32xi32>
    %11 = arith.cmpi eq, %9, %10 : vector<16x32xi32>
    %12 = arith.extui %11 : vector<16x32xi1> to vector<16x32xi32>
    %13 = arith.sitofp %12 : vector<16x32xi32> to vector<16x32xf32>
    %cst_8 = arith.constant dense<0.000000e+00> : vector<16x128xf32>
    %14 = tpu.matmul %13, %0, %cst_8 {dimension_numbers = #tpu.dot_dimension_numbers<[1], [0], [0], [1], [0, 0, 1, 1], [], []>} : vector<16x32xf32>, vector<32x128xf32>, vector<16x128xf32> -> vector<16x128xf32>
    %cst_9 = arith.constant 0.000000e+00 : f32
    %15 = vector.broadcast %cst_9 : f32 to vector<2x32xf32>
    %cst_10 = arith.constant 0.000000e+00 : f32
    %16 = vector.broadcast %cst_10 : f32 to vector<2x32xf32>
    %17 = vector.extract_strided_slice %14 {offsets = [0, 0], sizes = [2, 128], strides = [1, 1]} : vector<16x128xf32> to vector<2x128xf32>
    %18 = arith.addf %17, %7 : vector<2x128xf32>
    %cst_11 = arith.constant dense<0.000000e+00> : vector<2x128xf32>
    %19 = tpu.matmul %15, %1, %cst_11 {dimension_numbers = #tpu.dot_dimension_numbers<[1], [0], [0], [1], [0, 0, 1, 1], [], []>} : vector<2x32xf32>, vector<32x128xf32>, vector<2x128xf32> -> vector<2x128xf32>
    %20 = arith.addf %18, %19 : vector<2x128xf32>
    %21 = arith.negf %20 : vector<2x128xf32>
    %22 = math.exp %21 : vector<2x128xf32>
    %cst_12 = arith.constant 1.000000e+00 : f32
    %23 = vector.broadcast %cst_12 : f32 to vector<2x128xf32>
    %24 = arith.addf %23, %22 : vector<2x128xf32>
    %25 = arith.divf %23, %24 : vector<2x128xf32>
    %26 = math.tanh %20 : vector<2x128xf32>
    %27 = vector.extract_strided_slice %25 {offsets = [0, 0], sizes = [2, 32], strides = [1, 1]} : vector<2x128xf32> to vector<2x32xf32>
    %28 = vector.extract_strided_slice %25 {offsets = [0, 32], sizes = [2, 32], strides = [1, 1]} : vector<2x128xf32> to vector<2x32xf32>
    %29 = vector.extract_strided_slice %25 {offsets = [0, 64], sizes = [2, 32], strides = [1, 1]} : vector<2x128xf32> to vector<2x32xf32>
    %30 = vector.extract_strided_slice %26 {offsets = [0, 96], sizes = [2, 32], strides = [1, 1]} : vector<2x128xf32> to vector<2x32xf32>
    %31 = arith.mulf %28, %16 : vector<2x32xf32>
    %32 = arith.mulf %27, %30 : vector<2x32xf32>
    %33 = arith.addf %31, %32 : vector<2x32xf32>
    %34 = math.tanh %33 : vector<2x32xf32>
    %35 = arith.mulf %29, %34 : vector<2x32xf32>
    %36 = vector.extract_strided_slice %14 {offsets = [2, 0], sizes = [2, 128], strides = [1, 1]} : vector<16x128xf32> to vector<2x128xf32>
    %37 = arith.addf %36, %7 : vector<2x128xf32>
    %cst_13 = arith.constant dense<0.000000e+00> : vector<2x128xf32>
    %38 = tpu.matmul %35, %1, %cst_13 {dimension_numbers = #tpu.dot_dimension_numbers<[1], [0], [0], [1], [0, 0, 1, 1], [], []>} : vector<2x32xf32>, vector<32x128xf32>, vector<2x128xf32> -> vector<2x128xf32>
    %39 = arith.addf %37, %38 : vector<2x128xf32>
    %40 = arith.negf %39 : vector<2x128xf32>
    %41 = math.exp %40 : vector<2x128xf32>
    %cst_14 = arith.constant 1.000000e+00 : f32
    %42 = vector.broadcast %cst_14 : f32 to vector<2x128xf32>
    %43 = arith.addf %42, %41 : vector<2x128xf32>
    %44 = arith.divf %42, %43 : vector<2x128xf32>
    %45 = math.tanh %39 : vector<2x128xf32>
    %46 = vector.extract_strided_slice %44 {offsets = [0, 0], sizes = [2, 32], strides = [1, 1]} : vector<2x128xf32> to vector<2x32xf32>
    %47 = vector.extract_strided_slice %44 {offsets = [0, 32], sizes = [2, 32], strides = [1, 1]} : vector<2x128xf32> to vector<2x32xf32>
    %48 = vector.extract_strided_slice %44 {offsets = [0, 64], sizes = [2, 32], strides = [1, 1]} : vector<2x128xf32> to vector<2x32xf32>
    %49 = vector.extract_strided_slice %45 {offsets = [0, 96], sizes = [2, 32], strides = [1, 1]} : vector<2x128xf32> to vector<2x32xf32>
    %50 = arith.mulf %47, %33 : vector<2x32xf32>
    %51 = arith.mulf %46, %49 : vector<2x32xf32>
    %52 = arith.addf %50, %51 : vector<2x32xf32>
    %53 = math.tanh %52 : vector<2x32xf32>
    %54 = arith.mulf %48, %53 : vector<2x32xf32>
    %55 = vector.extract_strided_slice %14 {offsets = [4, 0], sizes = [2, 128], strides = [1, 1]} : vector<16x128xf32> to vector<2x128xf32>
    %56 = arith.addf %55, %7 : vector<2x128xf32>
    %cst_15 = arith.constant dense<0.000000e+00> : vector<2x128xf32>
    %57 = tpu.matmul %54, %1, %cst_15 {dimension_numbers = #tpu.dot_dimension_numbers<[1], [0], [0], [1], [0, 0, 1, 1], [], []>} : vector<2x32xf32>, vector<32x128xf32>, vector<2x128xf32> -> vector<2x128xf32>
    %58 = arith.addf %56, %57 : vector<2x128xf32>
    %59 = arith.negf %58 : vector<2x128xf32>
    %60 = math.exp %59 : vector<2x128xf32>
    %cst_16 = arith.constant 1.000000e+00 : f32
    %61 = vector.broadcast %cst_16 : f32 to vector<2x128xf32>
    %62 = arith.addf %61, %60 : vector<2x128xf32>
    %63 = arith.divf %61, %62 : vector<2x128xf32>
    %64 = math.tanh %58 : vector<2x128xf32>
    %65 = vector.extract_strided_slice %63 {offsets = [0, 0], sizes = [2, 32], strides = [1, 1]} : vector<2x128xf32> to vector<2x32xf32>
    %66 = vector.extract_strided_slice %63 {offsets = [0, 32], sizes = [2, 32], strides = [1, 1]} : vector<2x128xf32> to vector<2x32xf32>
    %67 = vector.extract_strided_slice %63 {offsets = [0, 64], sizes = [2, 32], strides = [1, 1]} : vector<2x128xf32> to vector<2x32xf32>
    %68 = vector.extract_strided_slice %64 {offsets = [0, 96], sizes = [2, 32], strides = [1, 1]} : vector<2x128xf32> to vector<2x32xf32>
    %69 = arith.mulf %66, %52 : vector<2x32xf32>
    %70 = arith.mulf %65, %68 : vector<2x32xf32>
    %71 = arith.addf %69, %70 : vector<2x32xf32>
    %72 = math.tanh %71 : vector<2x32xf32>
    %73 = arith.mulf %67, %72 : vector<2x32xf32>
    %74 = vector.extract_strided_slice %14 {offsets = [6, 0], sizes = [2, 128], strides = [1, 1]} : vector<16x128xf32> to vector<2x128xf32>
    %75 = arith.addf %74, %7 : vector<2x128xf32>
    %cst_17 = arith.constant dense<0.000000e+00> : vector<2x128xf32>
    %76 = tpu.matmul %73, %1, %cst_17 {dimension_numbers = #tpu.dot_dimension_numbers<[1], [0], [0], [1], [0, 0, 1, 1], [], []>} : vector<2x32xf32>, vector<32x128xf32>, vector<2x128xf32> -> vector<2x128xf32>
    %77 = arith.addf %75, %76 : vector<2x128xf32>
    %78 = arith.negf %77 : vector<2x128xf32>
    %79 = math.exp %78 : vector<2x128xf32>
    %cst_18 = arith.constant 1.000000e+00 : f32
    %80 = vector.broadcast %cst_18 : f32 to vector<2x128xf32>
    %81 = arith.addf %80, %79 : vector<2x128xf32>
    %82 = arith.divf %80, %81 : vector<2x128xf32>
    %83 = math.tanh %77 : vector<2x128xf32>
    %84 = vector.extract_strided_slice %82 {offsets = [0, 0], sizes = [2, 32], strides = [1, 1]} : vector<2x128xf32> to vector<2x32xf32>
    %85 = vector.extract_strided_slice %82 {offsets = [0, 32], sizes = [2, 32], strides = [1, 1]} : vector<2x128xf32> to vector<2x32xf32>
    %86 = vector.extract_strided_slice %82 {offsets = [0, 64], sizes = [2, 32], strides = [1, 1]} : vector<2x128xf32> to vector<2x32xf32>
    %87 = vector.extract_strided_slice %83 {offsets = [0, 96], sizes = [2, 32], strides = [1, 1]} : vector<2x128xf32> to vector<2x32xf32>
    %88 = arith.mulf %85, %71 : vector<2x32xf32>
    %89 = arith.mulf %84, %87 : vector<2x32xf32>
    %90 = arith.addf %88, %89 : vector<2x32xf32>
    %91 = math.tanh %90 : vector<2x32xf32>
    %92 = arith.mulf %86, %91 : vector<2x32xf32>
    %93 = vector.extract_strided_slice %14 {offsets = [8, 0], sizes = [2, 128], strides = [1, 1]} : vector<16x128xf32> to vector<2x128xf32>
    %94 = arith.addf %93, %7 : vector<2x128xf32>
    %cst_19 = arith.constant dense<0.000000e+00> : vector<2x128xf32>
    %95 = tpu.matmul %92, %1, %cst_19 {dimension_numbers = #tpu.dot_dimension_numbers<[1], [0], [0], [1], [0, 0, 1, 1], [], []>} : vector<2x32xf32>, vector<32x128xf32>, vector<2x128xf32> -> vector<2x128xf32>
    %96 = arith.addf %94, %95 : vector<2x128xf32>
    %97 = arith.negf %96 : vector<2x128xf32>
    %98 = math.exp %97 : vector<2x128xf32>
    %cst_20 = arith.constant 1.000000e+00 : f32
    %99 = vector.broadcast %cst_20 : f32 to vector<2x128xf32>
    %100 = arith.addf %99, %98 : vector<2x128xf32>
    %101 = arith.divf %99, %100 : vector<2x128xf32>
    %102 = math.tanh %96 : vector<2x128xf32>
    %103 = vector.extract_strided_slice %101 {offsets = [0, 0], sizes = [2, 32], strides = [1, 1]} : vector<2x128xf32> to vector<2x32xf32>
    %104 = vector.extract_strided_slice %101 {offsets = [0, 32], sizes = [2, 32], strides = [1, 1]} : vector<2x128xf32> to vector<2x32xf32>
    %105 = vector.extract_strided_slice %101 {offsets = [0, 64], sizes = [2, 32], strides = [1, 1]} : vector<2x128xf32> to vector<2x32xf32>
    %106 = vector.extract_strided_slice %102 {offsets = [0, 96], sizes = [2, 32], strides = [1, 1]} : vector<2x128xf32> to vector<2x32xf32>
    %107 = arith.mulf %104, %90 : vector<2x32xf32>
    %108 = arith.mulf %103, %106 : vector<2x32xf32>
    %109 = arith.addf %107, %108 : vector<2x32xf32>
    %110 = math.tanh %109 : vector<2x32xf32>
    %111 = arith.mulf %105, %110 : vector<2x32xf32>
    %112 = vector.extract_strided_slice %14 {offsets = [10, 0], sizes = [2, 128], strides = [1, 1]} : vector<16x128xf32> to vector<2x128xf32>
    %113 = arith.addf %112, %7 : vector<2x128xf32>
    %cst_21 = arith.constant dense<0.000000e+00> : vector<2x128xf32>
    %114 = tpu.matmul %111, %1, %cst_21 {dimension_numbers = #tpu.dot_dimension_numbers<[1], [0], [0], [1], [0, 0, 1, 1], [], []>} : vector<2x32xf32>, vector<32x128xf32>, vector<2x128xf32> -> vector<2x128xf32>
    %115 = arith.addf %113, %114 : vector<2x128xf32>
    %116 = arith.negf %115 : vector<2x128xf32>
    %117 = math.exp %116 : vector<2x128xf32>
    %cst_22 = arith.constant 1.000000e+00 : f32
    %118 = vector.broadcast %cst_22 : f32 to vector<2x128xf32>
    %119 = arith.addf %118, %117 : vector<2x128xf32>
    %120 = arith.divf %118, %119 : vector<2x128xf32>
    %121 = math.tanh %115 : vector<2x128xf32>
    %122 = vector.extract_strided_slice %120 {offsets = [0, 0], sizes = [2, 32], strides = [1, 1]} : vector<2x128xf32> to vector<2x32xf32>
    %123 = vector.extract_strided_slice %120 {offsets = [0, 32], sizes = [2, 32], strides = [1, 1]} : vector<2x128xf32> to vector<2x32xf32>
    %124 = vector.extract_strided_slice %120 {offsets = [0, 64], sizes = [2, 32], strides = [1, 1]} : vector<2x128xf32> to vector<2x32xf32>
    %125 = vector.extract_strided_slice %121 {offsets = [0, 96], sizes = [2, 32], strides = [1, 1]} : vector<2x128xf32> to vector<2x32xf32>
    %126 = arith.mulf %123, %109 : vector<2x32xf32>
    %127 = arith.mulf %122, %125 : vector<2x32xf32>
    %128 = arith.addf %126, %127 : vector<2x32xf32>
    %129 = math.tanh %128 : vector<2x32xf32>
    %130 = arith.mulf %124, %129 : vector<2x32xf32>
    %131 = vector.extract_strided_slice %14 {offsets = [12, 0], sizes = [2, 128], strides = [1, 1]} : vector<16x128xf32> to vector<2x128xf32>
    %132 = arith.addf %131, %7 : vector<2x128xf32>
    %cst_23 = arith.constant dense<0.000000e+00> : vector<2x128xf32>
    %133 = tpu.matmul %130, %1, %cst_23 {dimension_numbers = #tpu.dot_dimension_numbers<[1], [0], [0], [1], [0, 0, 1, 1], [], []>} : vector<2x32xf32>, vector<32x128xf32>, vector<2x128xf32> -> vector<2x128xf32>
    %134 = arith.addf %132, %133 : vector<2x128xf32>
    %135 = arith.negf %134 : vector<2x128xf32>
    %136 = math.exp %135 : vector<2x128xf32>
    %cst_24 = arith.constant 1.000000e+00 : f32
    %137 = vector.broadcast %cst_24 : f32 to vector<2x128xf32>
    %138 = arith.addf %137, %136 : vector<2x128xf32>
    %139 = arith.divf %137, %138 : vector<2x128xf32>
    %140 = math.tanh %134 : vector<2x128xf32>
    %141 = vector.extract_strided_slice %139 {offsets = [0, 0], sizes = [2, 32], strides = [1, 1]} : vector<2x128xf32> to vector<2x32xf32>
    %142 = vector.extract_strided_slice %139 {offsets = [0, 32], sizes = [2, 32], strides = [1, 1]} : vector<2x128xf32> to vector<2x32xf32>
    %143 = vector.extract_strided_slice %139 {offsets = [0, 64], sizes = [2, 32], strides = [1, 1]} : vector<2x128xf32> to vector<2x32xf32>
    %144 = vector.extract_strided_slice %140 {offsets = [0, 96], sizes = [2, 32], strides = [1, 1]} : vector<2x128xf32> to vector<2x32xf32>
    %145 = arith.mulf %142, %128 : vector<2x32xf32>
    %146 = arith.mulf %141, %144 : vector<2x32xf32>
    %147 = arith.addf %145, %146 : vector<2x32xf32>
    %148 = math.tanh %147 : vector<2x32xf32>
    %149 = arith.mulf %143, %148 : vector<2x32xf32>
    %150 = vector.extract_strided_slice %14 {offsets = [14, 0], sizes = [2, 128], strides = [1, 1]} : vector<16x128xf32> to vector<2x128xf32>
    %151 = arith.addf %150, %7 : vector<2x128xf32>
    %cst_25 = arith.constant dense<0.000000e+00> : vector<2x128xf32>
    %152 = tpu.matmul %149, %1, %cst_25 {dimension_numbers = #tpu.dot_dimension_numbers<[1], [0], [0], [1], [0, 0, 1, 1], [], []>} : vector<2x32xf32>, vector<32x128xf32>, vector<2x128xf32> -> vector<2x128xf32>
    %153 = arith.addf %151, %152 : vector<2x128xf32>
    %154 = arith.negf %153 : vector<2x128xf32>
    %155 = math.exp %154 : vector<2x128xf32>
    %cst_26 = arith.constant 1.000000e+00 : f32
    %156 = vector.broadcast %cst_26 : f32 to vector<2x128xf32>
    %157 = arith.addf %156, %155 : vector<2x128xf32>
    %158 = arith.divf %156, %157 : vector<2x128xf32>
    %159 = math.tanh %153 : vector<2x128xf32>
    %160 = vector.extract_strided_slice %158 {offsets = [0, 0], sizes = [2, 32], strides = [1, 1]} : vector<2x128xf32> to vector<2x32xf32>
    %161 = vector.extract_strided_slice %158 {offsets = [0, 32], sizes = [2, 32], strides = [1, 1]} : vector<2x128xf32> to vector<2x32xf32>
    %162 = vector.extract_strided_slice %158 {offsets = [0, 64], sizes = [2, 32], strides = [1, 1]} : vector<2x128xf32> to vector<2x32xf32>
    %163 = vector.extract_strided_slice %159 {offsets = [0, 96], sizes = [2, 32], strides = [1, 1]} : vector<2x128xf32> to vector<2x32xf32>
    %164 = arith.mulf %161, %147 : vector<2x32xf32>
    %165 = arith.mulf %160, %163 : vector<2x32xf32>
    %166 = arith.addf %164, %165 : vector<2x32xf32>
    %167 = math.tanh %166 : vector<2x32xf32>
    %168 = arith.mulf %162, %167 : vector<2x32xf32>
    %c0_27 = arith.constant 0 : index
    %c0_28 = arith.constant 0 : index
    %c0_29 = arith.constant 0 : index
    %169 = vector.load %arg3[%c0_27, %c0_28, %c0_29] : memref<2x2x32xf32, #tpu.memory_space<vmem>>, vector<1x2x32xf32>
    %170 = vector.shape_cast %169 : vector<1x2x32xf32> to vector<2x32xf32>
    %171 = vector.shape_cast %168 : vector<2x32xf32> to vector<1x2x32xf32>
    tpu.vector_store %arg3[%c0_27, %c0_28, %c0_29], %171 {strides = array<i32>} : memref<2x2x32xf32, #tpu.memory_space<vmem>>, vector<1x2x32xf32>,
    %c1 = arith.constant 1 : index
    %c0_30 = arith.constant 0 : index
    %c0_31 = arith.constant 0 : index
    %172 = vector.load %arg3[%c1, %c0_30, %c0_31] : memref<2x2x32xf32, #tpu.memory_space<vmem>>, vector<1x2x32xf32>
    %173 = vector.shape_cast %172 : vector<1x2x32xf32> to vector<2x32xf32>
    %174 = vector.shape_cast %166 : vector<2x32xf32> to vector<1x2x32xf32>
    tpu.vector_store %arg3[%c1, %c0_30, %c0_31], %174 {strides = array<i32>} : memref<2x2x32xf32, #tpu.memory_space<vmem>>, vector<1x2x32xf32>,
    return
  }
}

</mosaic_0001>

<bundles_post_ra>
// kernel: forward.1
= control target key start
LH: loop header
LB: loop body
LE: loop exit
PB: predicated region body
PF: predicated region fallthrough
CT: control target
= control target key end

     0   :  { %8 = vsyncpa [#allocation3], 0  ;;  %s818_s15 = smov [#allocation2]   ;;  %s819_s17 = smov 128   ;;  %s943_s0 = inlined_call_operand.vmem [shape: s32[16,1], index: 0, kind: input, shape index: {}]   ;;  %s944_s1 = inlined_call_operand.vmem [shape: f32[2,12], index: 1, kind: input, shape index: {}]   ;;  %s945_s2 = inlined_call_operand.hbm [shape: f32[88,128], index: 2, kind: input, shape index: {}]   ;;  %s946_s3 = inlined_call_operand.vmem [shape: f32[2,2,32], index: 3, kind: output, shape index: {}]  }
   0x1   :  { %s17_s14 = sshll.u32 %s945_s2, 4  ;;  %s19_s16 = sshll.u32 %s818_s15, 4  ;;  %s18_s14 = int_to_ptr.hbm [resolvable:$true] %s17_s14  ;;  %s20_s16 = int_to_ptr.vmem [resolvable:$true] %s19_s16 }
   0x2   :  { %s820_s18 = smov 8  }
   0x3   :  { %25 = dma.hbm_to_vmem [thread:$0]  %s18_s14, 1408, %s20_s16, [#allocation3], %s819_s17, %s819_s17, %s820_s18  }
   0x4   :  { %816 = dma.done.wait [#allocation3], 1408  }
   0x5   :  { %817 = vsyncadd [#allocation3], 4294965888  ;;  %v821_v0 = vmov 0   ;;  %vm47_vm0 = vcmask 1043456   ;;  %v71_v1 = vld [vmem:[%s943_s0] sm:$0xff]  ;;  %v37_v2 = vld [vmem:[#allocation2 + $0x38] sm:$0xff]  ;;  %v73_v14 = vlaneseq }
   0x6   :  { %725 = vset.pattern.permute.xlu0 %v821_v0  ;;  %726 = vset.pattern.permute.xlu2 %v821_v0  ;;  %v36_v3 = vld [vmem:[#allocation2 + $0x30] sm:$0xff]  ;;  %v33_v5 = vld [vmem:[#allocation2 + $0x18] sm:$0xff]  ;;  %v35_v6 = vld [vmem:[#allocation2 + $0x28] sm:$0xff]  ;;  %vm43_vm1 = vcmask 97280   ;;  %v822_v11 = vmov 0.0   ;;  %vm87_vm2 = vcmask 261120  }
   0x7   :  { %76 = vperm.xlu0 %725, %v71_v1   ;;  %133 = vmatpush.msra.mxu2 %v37_v2  ;;  %v40_v4 = vld [vmem:[#allocation2 + $0x50] sm:$0xf]  ;;  %v39_v7 = vld [vmem:[#allocation2 + $0x48] sm:$0xff]  ;;  %v41_v9 = vld [vmem:[%s944_s1] sm:$0x3]  ;;  %v856_v15 = vand.u32 127, %v73_v14 }
   0x8   :  { %695 = vmatpush.msk.msra.mxu0 %vm47_vm0, %v40_v4  ;;  %106 = vmatpush.msra.mxu1 %v33_v5  ;;  %v32_v8 = vld [vmem:[#allocation2 + $0x10] sm:$0xff]  ;;  %v34_v10 = vld [vmem:[#allocation2 + $0x20] sm:$0xff]  ;;  %v31_v12 = vld [vmem:[#allocation2 + $0x8] sm:$0xff]  ;;  %s823_s1 = smov 32   ;;  %s824_s22 = smov 64  }
   0x9   :  { %134 = vmatpush.msra.mxu2 %v36_v3  ;;  %200 = vmatpush.msra.mxu3 %v37_v2  ;;  %v30_v13 = vld [vmem:[#allocation2] sm:$0xff] }
   0xa   :  { %66 = vmatpush.msra.mxu0 %v39_v7  ;;  %107 = vmatpush.msra.mxu1 %v32_v8  ;;  %v727_v18 = vld [vmem:[#allocation2 + $0x40] ss:$0 sm:$0xff] }
   0xb   :  { %135 = vmatpush.msra.mxu2 %v35_v6  ;;  %696 = vmatmul.msk.f32.vlgmr.msra.gmra.mxu0 %vm43_vm1, %v41_v9 }
   0xc   :  { %201 = vmatpush.msra.mxu3 %v36_v3  ;;  %273 = vmatpush.msrb.mxu0 %v37_v2 }
   0xd   :  { %136 = vmatpush.msra.mxu2 %v34_v10  ;;  %108 = vmatpush.msra.mxu1 %v31_v12 }
   0xe   :  { %137 = vmatmul.f32.vlgmr.msra.gmra.mxu2 %v822_v11  ;;  %202 = vmatpush.msra.mxu3 %v35_v6 }
   0xf   :  { %274 = vmatpush.msrb.mxu0 %v36_v3  ;;  %346 = vmatpush.msrb.mxu2 %v37_v2 }
  0x10   :  { %203 = vmatpush.msra.mxu3 %v34_v10  ;;  %109 = vmatpush.msra.mxu1 %v30_v13 }
  0x11   :  { %275 = vmatpush.msrb.mxu0 %v35_v6  ;;  %347 = vmatpush.msrb.mxu2 %v36_v3 }
  0x12   :  { %417 = vmatpush.msrb.mxu3 %v37_v2  ;;  %555 = vmatpush.msrb.mxu1 %v37_v2 }
  0x13   :  { %276 = vmatpush.msrb.mxu0 %v34_v10  ;;  %348 = vmatpush.msrb.mxu2 %v35_v6 }
  0x14   :  { %418 = vmatpush.msrb.mxu3 %v36_v3  ;;  %556 = vmatpush.msrb.mxu1 %v36_v3 }
  0x15   :  { %484 = vmatpush.msra.mxu0 %v37_v2  ;;  %349 = vmatpush.msrb.mxu2 %v34_v10 }
  0x16   :  { %419 = vmatpush.msrb.mxu3 %v35_v6  ;;  %557 = vmatpush.msrb.mxu1 %v35_v6 }
  0x17   :  { %485 = vmatpush.msra.mxu0 %v36_v3  ;;  %626 = vmatpush.msra.mxu2 %v37_v2 }
  0x18   :  { %420 = vmatpush.msrb.mxu3 %v34_v10  ;;  %558 = vmatpush.msrb.mxu1 %v34_v10 }
  0x19   :  { %486 = vmatpush.msra.mxu0 %v35_v6  ;;  %627 = vmatpush.msra.mxu2 %v36_v3 }
  0x1b   :  { %487 = vmatpush.msra.mxu0 %v34_v10  ;;  %628 = vmatpush.msra.mxu2 %v35_v6 }
  0x1d   :  { %629 = vmatpush.msra.mxu2 %v34_v10 }
  0x79   :  { %v77_v16 = vpop.permute.xlu0 %76 }
  0x7a   :  { %vm81_vm3 = vcmp.eq.s32.totalorder %v856_v15, %v77_v16 }
  0x7b   :  { %v697_v17 = vsel %vm81_vm3, 1.0, %v822_v11 }
  0x7c   :  { %699 = vmatmul.msk.f32.vlgmr.msra.gmra.mxu1 %vm87_vm2, %v697_v17 }
  0x88   :  { %v68_v19 = vpop.f32.mrf.mxu0 }
  0x89   :  { %v861_v20 = vadd.f32 %v727_v18, %v68_v19 }
  0x8b   :  { %v180_v48 = vrot.slane %v861_v20, 6  ;;  %v252_v16 = vrot.slane %v861_v20, 4 }
  0x91   :  { %v138_v22 = vpop.f32.mrf.mxu2 }
  0xf9   :  { %v863_v21 = vpop.f32.mrf.mxu1 }
  0xfa   :  { %v117_v23 = vadd.f32 %v863_v21, %v861_v20  ;;  %v182_v50 = vadd.f32 %v180_v48, %v863_v21  ;;  %v254_v18 = vadd.f32 %v252_v16, %v863_v21 }
  0xfc   :  { %v141_v24 = vadd.f32 %v138_v22, %v117_v23 }
  0xfe   :  { %728 = vtanh.f32 %v141_v24  ;;  %v701_v26 = vmul.f32 -1.442695, %v141_v24 }
 0x100   :  { %730 = vpow2.f32 %v701_v26 }
 0x104   :  { %v729_v25 = vpop.eup %728 }
 0x105   :  { %164 = vrot.lane.b32.xlu0 %v729_v25, %s823_s1 }
 0x106   :  { %v731_v27 = vpop.eup %730 }
 0x107   :  { %v145_v28 = vadd.f32 1.0, %v731_v27 }
 0x109   :  { %732 = vrcp.f32 %v145_v28  ;;  %v157_v34 = vand.u32 2147483648, %v145_v28  ;;  %vm151_vm5 = vweird.f32 %v145_v28  ;;  %v155_v35 = vand.u32 2147483647, %v145_v28 }
 0x10b   :  { %v158_v37 = vor.u32 1.1754944e-38, %v157_v34  ;;  %vm156_vm7 = vcmp.eq.f32.partialorder %v155_v35, 8.507059e+37 }
 0x10f   :  { %v733_v29 = vpop.eup %732 }
 0x110   :  { %v147_v30 = vmul.f32 %v733_v29, %v145_v28  ;;  %vm152_vm4 = vweird.f32 %v733_v29 }
 0x111   :  { %vm153_vm6 = vmor %vm151_vm5, %vm152_vm4 }
 0x112   :  { %v148_v31 = vsub.f32 1.0, %v147_v30 }
 0x114   :  { %v149_v32 = vmul.f32 %v733_v29, %v148_v31 }
 0x116   :  { %v150_v33 = vadd.f32 %v733_v29, %v149_v32 }
 0x118   :  { %v154_v36 = vsel %vm153_vm6, %v733_v29, %v150_v33 }
 0x119   :  { %v159_v39 = vsel %vm156_vm7, %v158_v37, %v154_v36 }
 0x11a   :  { %v162_v41 = vmul.f32 0.0, %v159_v39 }
 0x177   :  { %v165_v38 = vpop.permute.xlu0 %164 }
 0x178   :  { %v167_v40 = vmul.f32 %v165_v38, %v159_v39 }
 0x17a   :  { %169 = vrot.lane.b32.xlu1 %v167_v40, %s823_s1 }
 0x1ec   :  { %v170_v42 = vpop.permute.xlu1 %169 }
 0x1ed   :  { %v172_v43 = vadd.f32 %v170_v42, %v162_v41 }
 0x1ef   :  { %734 = vtanh.f32 %v172_v43  ;;  %v233_v5 = vrot.slane %v172_v43, 6 }
 0x1f5   :  { %v735_v44 = vpop.eup %734 }
 0x1f6   :  { %175 = vrot.lane.b32.xlu1 %v735_v44, %s823_s1 }
 0x268   :  { %v176_v45 = vpop.permute.xlu1 %175 }
 0x269   :  { %v178_v46 = vmul.f32 %v176_v45, %v159_v39 }
 0x26b   :  { %184 = vrot.lane.b32.xlu2 %v178_v46, %s824_s22 }
 0x2c5   :  { %v185_v47 = vpop.permute.xlu2 %184 }
 0x2c6   :  { %702 = vmatmul.msk.f32.vlgmr.msra.gmra.mxu3 %vm87_vm2, %v185_v47 }
 0x349   :  { %v205_v49 = vpop.f32.mrf.mxu3 }
 0x34a   :  { %v209_v51 = vrot.slane %v205_v49, 6  ;;  %v325_v49 = vrot.slane %v861_v20, 2 }
 0x34c   :  { %v211_v52 = vadd.f32 %v209_v51, %v182_v50  ;;  %v327_v51 = vadd.f32 %v325_v49, %v863_v21 }
 0x34e   :  { %736 = vtanh.f32 %v211_v52  ;;  %v703_v54 = vmul.f32 -1.442695, %v211_v52 }
 0x350   :  { %738 = vpow2.f32 %v703_v54 }
 0x354   :  { %v737_v53 = vpop.eup %736 }
 0x355   :  { %237 = vrot.lane.b32.xlu2 %v737_v53, %s823_s1 }
 0x356   :  { %v739_v55 = vpop.eup %738 }
 0x357   :  { %v215_v56 = vadd.f32 1.0, %v739_v55 }
 0x359   :  { %740 = vrcp.f32 %v215_v56  ;;  %v227_v62 = vand.u32 2147483648, %v215_v56  ;;  %vm221_vm9 = vweird.f32 %v215_v56  ;;  %v225_v63 = vand.u32 2147483647, %v215_v56 }
 0x35b   :  { %v228_v1 = vor.u32 1.1754944e-38, %v227_v62  ;;  %vm226_vm11 = vcmp.eq.f32.partialorder %v225_v63, 8.507059e+37 }
 0x35f   :  { %v741_v57 = vpop.eup %740 }
 0x360   :  { %v217_v58 = vmul.f32 %v741_v57, %v215_v56  ;;  %vm222_vm8 = vweird.f32 %v741_v57 }
 0x361   :  { %vm223_vm10 = vmor %vm221_vm9, %vm222_vm8 }
 0x362   :  { %v218_v59 = vsub.f32 1.0, %v217_v58 }
 0x364   :  { %v219_v60 = vmul.f32 %v741_v57, %v218_v59 }
 0x366   :  { %v220_v61 = vadd.f32 %v741_v57, %v219_v60 }
 0x368   :  { %v224_v0 = vsel %vm223_vm10, %v741_v57, %v220_v61 }
 0x369   :  { %v229_v3 = vsel %vm226_vm11, %v228_v1, %v224_v0 }
 0x36a   :  { %v235_v6 = vmul.f32 %v233_v5, %v229_v3  ;;  %v72_v5 = vld [vmem:[%s943_s0 + $0x8] sm:$0xff]  ;;  %s825_s0 = smov 96  }
 0x3af   :  { %v238_v2 = vpop.permute.xlu2 %237 }
 0x3b0   :  { %v240_v4 = vmul.f32 %v238_v2, %v229_v3 }
 0x3b2   :  { %242 = vrot.lane.b32.xlu0 %v240_v4, %s823_s1 }
 0x424   :  { %v243_v7 = vpop.permute.xlu0 %242 }
 0x425   :  { %v245_v8 = vadd.f32 %v243_v7, %v235_v6 }
 0x427   :  { %742 = vtanh.f32 %v245_v8  ;;  %v306_v39 = vrot.slane %v245_v8, 6 }
 0x42d   :  { %v743_v9 = vpop.eup %742 }
 0x42e   :  { %248 = vrot.lane.b32.xlu1 %v743_v9, %s823_s1 }
 0x4a0   :  { %v249_v10 = vpop.permute.xlu1 %248 }
 0x4a1   :  { %v251_v12 = vmul.f32 %v249_v10, %v229_v3 }
 0x4a3   :  { %v256_v13 = vrot.slane %v251_v12, 2 }
 0x4a5   :  { %257 = vrot.lane.b32.xlu2 %v256_v13, %s824_s22 }
 0x4ff   :  { %v258_v14 = vpop.permute.xlu2 %257 }
 0x500   :  { %704 = vmatmul.msk.f32.vlgmr.msrb.gmra.mxu0 %vm87_vm2, %v258_v14 }
 0x57d   :  { %v278_v17 = vpop.f32.mrf.mxu0 }
 0x57e   :  { %v282_v19 = vrot.slane %v278_v17, 4 }
 0x580   :  { %v284_v22 = vadd.f32 %v282_v19, %v254_v18 }
 0x582   :  { %744 = vtanh.f32 %v284_v22  ;;  %v705_v24 = vmul.f32 -1.442695, %v284_v22 }
 0x584   :  { %746 = vpow2.f32 %v705_v24 }
 0x588   :  { %v745_v23 = vpop.eup %744 }
 0x589   :  { %310 = vrot.lane.b32.xlu0 %v745_v23, %s823_s1 }
 0x58a   :  { %v747_v25 = vpop.eup %746 }
 0x58b   :  { %v288_v26 = vadd.f32 1.0, %v747_v25 }
 0x58d   :  { %748 = vrcp.f32 %v288_v26  ;;  %v300_v32 = vand.u32 2147483648, %v288_v26  ;;  %vm294_vm13 = vweird.f32 %v288_v26  ;;  %v298_v33 = vand.u32 2147483647, %v288_v26 }
 0x58f   :  { %v301_v35 = vor.u32 1.1754944e-38, %v300_v32  ;;  %vm299_vm15 = vcmp.eq.f32.partialorder %v298_v33, 8.507059e+37 }
 0x593   :  { %v749_v27 = vpop.eup %748 }
 0x594   :  { %v290_v28 = vmul.f32 %v749_v27, %v288_v26  ;;  %vm295_vm12 = vweird.f32 %v749_v27 }
 0x595   :  { %vm296_vm14 = vmor %vm294_vm13, %vm295_vm12 }
 0x596   :  { %v291_v29 = vsub.f32 1.0, %v290_v28 }
 0x598   :  { %v292_v30 = vmul.f32 %v749_v27, %v291_v29 }
 0x59a   :  { %v293_v31 = vadd.f32 %v749_v27, %v292_v30 }
 0x59c   :  { %v297_v34 = vsel %vm296_vm14, %v749_v27, %v293_v31 }
 0x59d   :  { %v302_v37 = vsel %vm299_vm15, %v301_v35, %v297_v34 }
 0x59e   :  { %v308_v40 = vmul.f32 %v306_v39, %v302_v37 }
 0x5fb   :  { %v311_v36 = vpop.permute.xlu0 %310 }
 0x5fc   :  { %v313_v38 = vmul.f32 %v311_v36, %v302_v37 }
 0x5fe   :  { %315 = vrot.lane.b32.xlu1 %v313_v38, %s823_s1 }
 0x670   :  { %v316_v41 = vpop.permute.xlu1 %315 }
 0x671   :  { %v318_v42 = vadd.f32 %v316_v41, %v308_v40 }
 0x673   :  { %750 = vtanh.f32 %v318_v42  ;;  %v379_v6 = vrot.slane %v318_v42, 6 }
 0x679   :  { %v751_v43 = vpop.eup %750 }
 0x67a   :  { %321 = vrot.lane.b32.xlu2 %v751_v43, %s823_s1 }
 0x6d4   :  { %v322_v44 = vpop.permute.xlu2 %321 }
 0x6d5   :  { %v324_v45 = vmul.f32 %v322_v44, %v302_v37 }
 0x6d7   :  { %v329_v46 = vrot.slane %v324_v45, 4 }
 0x6d9   :  { %330 = vrot.lane.b32.xlu0 %v329_v46, %s824_s22 }
 0x74b   :  { %v331_v47 = vpop.permute.xlu0 %330 }
 0x74c   :  { %706 = vmatmul.msk.f32.vlgmr.msrb.gmra.mxu2 %vm87_vm2, %v331_v47 }
 0x7cf   :  { %v351_v50 = vpop.f32.mrf.mxu2 }
 0x7d0   :  { %v355_v52 = vrot.slane %v351_v50, 2 }
 0x7d2   :  { %v357_v53 = vadd.f32 %v355_v52, %v327_v51 }
 0x7d4   :  { %752 = vtanh.f32 %v357_v53  ;;  %v707_v55 = vmul.f32 -1.442695, %v357_v53 }
 0x7d6   :  { %754 = vpow2.f32 %v707_v55 }
 0x7da   :  { %v753_v54 = vpop.eup %752 }
 0x7db   :  { %383 = vrot.lane.b32.xlu1 %v753_v54, %s823_s1 }
 0x7dc   :  { %v755_v56 = vpop.eup %754 }
 0x7dd   :  { %v361_v57 = vadd.f32 1.0, %v755_v56 }
 0x7df   :  { %756 = vrcp.f32 %v361_v57  ;;  %v373_v63 = vand.u32 2147483648, %v361_v57  ;;  %vm367_vm1 = vweird.f32 %v361_v57  ;;  %v371_v21 = vand.u32 2147483647, %v361_v57 }
 0x7e1   :  { %v374_v1 = vor.u32 1.1754944e-38, %v373_v63  ;;  %vm372_vm4 = vcmp.eq.f32.partialorder %v371_v21, 8.507059e+37 }
 0x7e5   :  { %v757_v58 = vpop.eup %756 }
 0x7e6   :  { %v363_v59 = vmul.f32 %v757_v58, %v361_v57  ;;  %vm368_vm0 = vweird.f32 %v757_v58 }
 0x7e7   :  { %vm369_vm3 = vmor %vm367_vm1, %vm368_vm0 }
 0x7e8   :  { %v364_v60 = vsub.f32 1.0, %v363_v59 }
 0x7ea   :  { %v365_v61 = vmul.f32 %v757_v58, %v364_v60 }
 0x7ec   :  { %v366_v62 = vadd.f32 %v757_v58, %v365_v61 }
 0x7ee   :  { %v370_v0 = vsel %vm369_vm3, %v757_v58, %v366_v62 }
 0x7ef   :  { %v375_v3 = vsel %vm372_vm4, %v374_v1, %v370_v0 }
 0x7f0   :  { %v381_v7 = vmul.f32 %v379_v6, %v375_v3 }
 0x84d   :  { %v384_v2 = vpop.permute.xlu1 %383 }
 0x84e   :  { %v386_v4 = vmul.f32 %v384_v2, %v375_v3 }
 0x850   :  { %388 = vrot.lane.b32.xlu2 %v386_v4, %s823_s1 }
 0x858   :  { %79 = vperm.xlu2 %726, %v72_v5  }
 0x8aa   :  { %v389_v8 = vpop.permute.xlu2 %388 }
 0x8ab   :  { %v391_v9 = vadd.f32 %v389_v8, %v381_v7 }
 0x8ad   :  { %758 = vtanh.f32 %v391_v9  ;;  %v447_v40 = vrot.slane %v391_v9, 6 }
 0x8b2   :  { %v80_v10 = vpop.permute.xlu2 %79 }
 0x8b3   :  { %v759_v12 = vpop.eup %758  ;;  %vm82_vm5 = vcmp.eq.s32.totalorder %v856_v15, %v80_v10 }
 0x8b4   :  { %v698_v13 = vsel %vm82_vm5, 1.0, %v822_v11  ;;  %394 = vrot.lane.b32.xlu0 %v759_v12, %s823_s1 }
 0x8b5   :  { %700 = vmatmul.msk.f32.gmra.mxu1 %vm87_vm2, %v698_v13 }
 0x926   :  { %v395_v14 = vpop.permute.xlu0 %394 }
 0x927   :  { %v397_v17 = vmul.f32 %v395_v14, %v375_v3 }
 0x929   :  { %v400_v18 = vrot.slane %v397_v17, 6 }
 0x92b   :  { %401 = vrot.lane.b32.xlu1 %v400_v18, %s824_s22 }
 0x932   :  { %v905_v22 = vpop.f32.mrf.mxu1 }
 0x933   :  { %v398_v23 = vadd.f32 %v905_v22, %v861_v20  ;;  %v466_v51 = vadd.f32 %v180_v48, %v905_v22  ;;  %v536_v17 = vadd.f32 %v252_v16, %v905_v22 }
 0x99d   :  { %v402_v19 = vpop.permute.xlu1 %401 }
 0x99e   :  { %708 = vmatmul.msk.f32.vlgmr.msrb.gmra.mxu3 %vm87_vm2, %v402_v19 }
 0xa21   :  { %v422_v15 = vpop.f32.mrf.mxu3 }
 0xa22   :  { %v425_v24 = vadd.f32 %v422_v15, %v398_v23 }
 0xa24   :  { %760 = vtanh.f32 %v425_v24  ;;  %v709_v25 = vmul.f32 -1.442695, %v425_v24 }
 0xa26   :  { %762 = vpow2.f32 %v709_v25 }
 0xa2a   :  { %v761_v11 = vpop.eup %760 }
 0xa2b   :  { %451 = vrot.lane.b32.xlu0 %v761_v11, %s823_s1 }
 0xa2c   :  { %v763_v26 = vpop.eup %762 }
 0xa2d   :  { %v429_v27 = vadd.f32 1.0, %v763_v26 }
 0xa2f   :  { %764 = vrcp.f32 %v429_v27  ;;  %v441_v33 = vand.u32 2147483648, %v429_v27  ;;  %vm435_vm7 = vweird.f32 %v429_v27  ;;  %v439_v34 = vand.u32 2147483647, %v429_v27 }
 0xa31   :  { %v442_v36 = vor.u32 1.1754944e-38, %v441_v33  ;;  %vm440_vm9 = vcmp.eq.f32.partialorder %v439_v34, 8.507059e+37 }
 0xa35   :  { %v765_v28 = vpop.eup %764 }
 0xa36   :  { %v431_v29 = vmul.f32 %v765_v28, %v429_v27  ;;  %vm436_vm6 = vweird.f32 %v765_v28 }
 0xa37   :  { %vm437_vm8 = vmor %vm435_vm7, %vm436_vm6  ;;  %vm682_vm6 = vcmask 261126  }
 0xa38   :  { %v432_v30 = vsub.f32 1.0, %v431_v29 }
 0xa3a   :  { %v433_v31 = vmul.f32 %v765_v28, %v432_v30 }
 0xa3c   :  { %v434_v32 = vadd.f32 %v765_v28, %v433_v31 }
 0xa3e   :  { %v438_v35 = vsel %vm437_vm8, %v765_v28, %v434_v32 }
 0xa3f   :  { %v443_v38 = vsel %vm440_vm9, %v442_v36, %v438_v35 }
 0xa40   :  { %v449_v41 = vmul.f32 %v447_v40, %v443_v38 }
 0xa9d   :  { %v452_v37 = vpop.permute.xlu0 %451 }
 0xa9e   :  { %v454_v39 = vmul.f32 %v452_v37, %v443_v38 }
 0xaa0   :  { %456 = vrot.lane.b32.xlu1 %v454_v39, %s823_s1 }
 0xb12   :  { %v457_v42 = vpop.permute.xlu1 %456 }
 0xb13   :  { %v459_v43 = vadd.f32 %v457_v42, %v449_v41 }
 0xb15   :  { %766 = vtanh.f32 %v459_v43  ;;  %v517_v4 = vrot.slane %v459_v43, 6 }
 0xb1b   :  { %v767_v44 = vpop.eup %766 }
 0xb1c   :  { %462 = vrot.lane.b32.xlu2 %v767_v44, %s823_s1 }
 0xb76   :  { %v463_v45 = vpop.permute.xlu2 %462 }
 0xb77   :  { %v465_v46 = vmul.f32 %v463_v45, %v443_v38 }
 0xb79   :  { %468 = vrot.lane.b32.xlu0 %v465_v46, %s824_s22  ;;  %v607_v46 = vadd.f32 %v325_v49, %v905_v22 }
 0xbeb   :  { %v469_v47 = vpop.permute.xlu0 %468 }
 0xbec   :  { %710 = vmatmul.msk.f32.vlgmr.msra.gmra.mxu0 %vm87_vm2, %v469_v47 }
 0xc69   :  { %v489_v50 = vpop.f32.mrf.mxu0 }
 0xc6a   :  { %v493_v52 = vrot.slane %v489_v50, 6 }
 0xc6c   :  { %v495_v53 = vadd.f32 %v493_v52, %v466_v51 }
 0xc6e   :  { %768 = vtanh.f32 %v495_v53  ;;  %v711_v55 = vmul.f32 -1.442695, %v495_v53 }
 0xc70   :  { %770 = vpow2.f32 %v711_v55 }
 0xc74   :  { %v769_v54 = vpop.eup %768 }
 0xc75   :  { %521 = vrot.lane.b32.xlu1 %v769_v54, %s823_s1 }
 0xc76   :  { %v771_v56 = vpop.eup %770 }
 0xc77   :  { %v499_v57 = vadd.f32 1.0, %v771_v56 }
 0xc79   :  { %772 = vrcp.f32 %v499_v57  ;;  %v511_v63 = vand.u32 2147483648, %v499_v57  ;;  %vm505_vm11 = vweird.f32 %v499_v57  ;;  %v509_v48 = vand.u32 2147483647, %v499_v57 }
 0xc7b   :  { %v512_v0 = vor.u32 1.1754944e-38, %v511_v63  ;;  %vm510_vm13 = vcmp.eq.f32.partialorder %v509_v48, 8.507059e+37 }
 0xc7f   :  { %v773_v58 = vpop.eup %772 }
 0xc80   :  { %v501_v59 = vmul.f32 %v773_v58, %v499_v57  ;;  %vm506_vm10 = vweird.f32 %v773_v58 }
 0xc81   :  { %vm507_vm12 = vmor %vm505_vm11, %vm506_vm10 }
 0xc82   :  { %v502_v60 = vsub.f32 1.0, %v501_v59 }
 0xc84   :  { %v503_v61 = vmul.f32 %v773_v58, %v502_v60 }
 0xc86   :  { %v504_v62 = vadd.f32 %v773_v58, %v503_v61 }
 0xc88   :  { %v508_v21 = vsel %vm507_vm12, %v773_v58, %v504_v62 }
 0xc89   :  { %v513_v2 = vsel %vm510_vm13, %v512_v0, %v508_v21 }
 0xc8a   :  { %v519_v5 = vmul.f32 %v517_v4, %v513_v2 }
 0xce7   :  { %v522_v1 = vpop.permute.xlu1 %521 }
 0xce8   :  { %v524_v3 = vmul.f32 %v522_v1, %v513_v2 }
 0xcea   :  { %526 = vrot.lane.b32.xlu2 %v524_v3, %s823_s1 }
 0xd44   :  { %v527_v6 = vpop.permute.xlu2 %526 }
 0xd45   :  { %v529_v7 = vadd.f32 %v527_v6, %v519_v5 }
 0xd47   :  { %774 = vtanh.f32 %v529_v7  ;;  %v588_v36 = vrot.slane %v529_v7, 6 }
 0xd4d   :  { %v775_v8 = vpop.eup %774 }
 0xd4e   :  { %532 = vrot.lane.b32.xlu0 %v775_v8, %s823_s1 }
 0xdc0   :  { %v533_v9 = vpop.permute.xlu0 %532 }
 0xdc1   :  { %v535_v10 = vmul.f32 %v533_v9, %v513_v2 }
 0xdc3   :  { %v538_v12 = vrot.slane %v535_v10, 2 }
 0xdc5   :  { %539 = vrot.lane.b32.xlu1 %v538_v12, %s824_s22 }
 0xe37   :  { %v540_v13 = vpop.permute.xlu1 %539 }
 0xe38   :  { %712 = vmatmul.msk.f32.vlgmr.msrb.gmra.mxu1 %vm87_vm2, %v540_v13 }
 0xeb5   :  { %v560_v14 = vpop.f32.mrf.mxu1 }
 0xeb6   :  { %v564_v18 = vrot.slane %v560_v14, 4 }
 0xeb8   :  { %v566_v19 = vadd.f32 %v564_v18, %v536_v17 }
 0xeba   :  { %776 = vtanh.f32 %v566_v19  ;;  %v713_v15 = vmul.f32 -1.442695, %v566_v19 }
 0xebc   :  { %778 = vpow2.f32 %v713_v15 }
 0xec0   :  { %v777_v23 = vpop.eup %776 }
 0xec1   :  { %592 = vrot.lane.b32.xlu2 %v777_v23, %s823_s1 }
 0xec2   :  { %v779_v24 = vpop.eup %778 }
 0xec3   :  { %v570_v11 = vadd.f32 1.0, %v779_v24 }
 0xec5   :  { %780 = vrcp.f32 %v570_v11  ;;  %v582_v30 = vand.u32 2147483648, %v570_v11  ;;  %vm576_vm15 = vweird.f32 %v570_v11  ;;  %v580_v16 = vand.u32 2147483647, %v570_v11 }
 0xec7   :  { %v583_v32 = vor.u32 1.1754944e-38, %v582_v30  ;;  %vm581_vm1 = vcmp.eq.f32.partialorder %v580_v16, 8.507059e+37 }
 0xecb   :  { %v781_v25 = vpop.eup %780 }
 0xecc   :  { %v572_v26 = vmul.f32 %v781_v25, %v570_v11  ;;  %vm577_vm14 = vweird.f32 %v781_v25 }
 0xecd   :  { %vm578_vm0 = vmor %vm576_vm15, %vm577_vm14 }
 0xece   :  { %v573_v27 = vsub.f32 1.0, %v572_v26 }
 0xed0   :  { %v574_v28 = vmul.f32 %v781_v25, %v573_v27 }
 0xed2   :  { %v575_v29 = vadd.f32 %v781_v25, %v574_v28 }
 0xed4   :  { %v579_v31 = vsel %vm578_vm0, %v781_v25, %v575_v29 }
 0xed5   :  { %v584_v34 = vsel %vm581_vm1, %v583_v32, %v579_v31 }
 0xed6   :  { %v590_v37 = vmul.f32 %v588_v36, %v584_v34 }
 0xf1b   :  { %v593_v33 = vpop.permute.xlu2 %592 }
 0xf1c   :  { %v595_v35 = vmul.f32 %v593_v33, %v584_v34 }
 0xf1e   :  { %597 = vrot.lane.b32.xlu0 %v595_v35, %s823_s1 }
 0xf90   :  { %v598_v38 = vpop.permute.xlu0 %597 }
 0xf91   :  { %v600_v39 = vadd.f32 %v598_v38, %v590_v37 }
 0xf93   :  { %782 = vtanh.f32 %v600_v39  ;;  %v659_v48 = vrot.slane %v600_v39, 6 }
 0xf99   :  { %v783_v40 = vpop.eup %782 }
 0xf9a   :  { %603 = vrot.lane.b32.xlu1 %v783_v40, %s823_s1 }
0x100c   :  { %v604_v41 = vpop.permute.xlu1 %603 }
0x100d   :  { %v606_v42 = vmul.f32 %v604_v41, %v584_v34 }
0x100f   :  { %v609_v43 = vrot.slane %v606_v42, 4 }
0x1011   :  { %610 = vrot.lane.b32.xlu2 %v609_v43, %s824_s22 }
0x106b   :  { %v611_v44 = vpop.permute.xlu2 %610 }
0x106c   :  { %714 = vmatmul.msk.f32.vlgmr.msra.gmra.mxu2 %vm87_vm2, %v611_v44 }
0x10ef   :  { %v631_v45 = vpop.f32.mrf.mxu2 }
0x10f0   :  { %v635_v47 = vrot.slane %v631_v45, 2 }
0x10f2   :  { %v637_v50 = vadd.f32 %v635_v47, %v607_v46 }
0x10f4   :  { %784 = vtanh.f32 %v637_v50  ;;  %v715_v52 = vmul.f32 -1.442695, %v637_v50 }
0x10f6   :  { %786 = vpow2.f32 %v715_v52 }
0x10fa   :  { %v785_v51 = vpop.eup %784 }
0x10fb   :  { %663 = vrot.lane.b32.xlu0 %v785_v51, %s823_s1 }
0x10fc   :  { %v787_v53 = vpop.eup %786 }
0x10fd   :  { %v641_v54 = vadd.f32 1.0, %v787_v53 }
0x10ff   :  { %788 = vrcp.f32 %v641_v54  ;;  %v653_v60 = vand.u32 2147483648, %v641_v54  ;;  %vm647_vm3 = vweird.f32 %v641_v54  ;;  %v651_v20 = vand.u32 2147483647, %v641_v54 }
0x1101   :  { %v654_v22 = vor.u32 1.1754944e-38, %v653_v60  ;;  %vm652_vm5 = vcmp.eq.f32.partialorder %v651_v20, 8.507059e+37 }
0x1105   :  { %v789_v55 = vpop.eup %788 }
0x1106   :  { %v643_v56 = vmul.f32 %v789_v55, %v641_v54  ;;  %vm648_vm2 = vweird.f32 %v789_v55 }
0x1107   :  { %vm649_vm4 = vmor %vm647_vm3, %vm648_vm2 }
0x1108   :  { %v644_v57 = vsub.f32 1.0, %v643_v56 }
0x110a   :  { %v645_v58 = vmul.f32 %v789_v55, %v644_v57 }
0x110c   :  { %v646_v59 = vadd.f32 %v789_v55, %v645_v58 }
0x110e   :  { %v650_v49 = vsel %vm649_vm4, %v789_v55, %v646_v59 }
0x110f   :  { %v655_v62 = vsel %vm652_vm5, %v654_v22, %v650_v49 }
0x1110   :  { %v661_v21 = vmul.f32 %v659_v48, %v655_v62 }
0x116d   :  { %v664_v61 = vpop.permute.xlu0 %663 }
0x116e   :  { %v666_v63 = vmul.f32 %v664_v61, %v655_v62 }
0x1170   :  { %668 = vrot.lane.b32.xlu1 %v666_v63, %s823_s1 }
0x11e2   :  { %v669_v0 = vpop.permute.xlu1 %668 }
0x11e3   :  { %v671_v1 = vadd.f32 %v669_v0, %v661_v21 }
0x11e5   :  { %790 = vtanh.f32 %v671_v1  ;;  %685 = vrot.lane.b32.xlu1 %v671_v1, %s825_s0 }
0x11eb   :  { %v791_v2 = vpop.eup %790 }
0x11ec   :  { %674 = vrot.lane.b32.xlu2 %v791_v2, %s823_s1 }
0x1246   :  { %v675_v3 = vpop.permute.xlu2 %674 }
0x1247   :  { %v677_v4 = vmul.f32 %v675_v3, %v655_v62 }
0x1249   :  { %679 = vrot.lane.b32.xlu0 %v677_v4, %s824_s22 }
0x1257   :  { %v686_v5 = vpop.permute.xlu1 %685 }
0x1258   :  { %716 = vst.msk [vmem:[%s946_s3 - $0x4] sm:$0xc0] %vm682_vm6, %v686_v5 }
0x12bb   :  { %v680_v6 = vpop.permute.xlu0 %679 }
0x12bc   :  { %683 = vst.msk [vmem:[%s946_s3 - $0x6] sm:$0xc0] %vm682_vm6, %v680_v6 }
0x12bd   :  { %694 = vsyncpa [#allocation3], 1 }

</bundles_post_ra>
